<compile_context>
chip_gen: v7x
topology: tpu7x:2x2x1
jax: 0.10.0
libtpu: 0.0.40
codegen_flags: <defaults>
</compile_context>

<pallas_src>
import jax
import jax.numpy as jnp
from jax.experimental import pallas as pl
from jax.experimental.pallas import tpu as pltpu


def _projector_kernel(x_ref, w_ref, b_ref, o_ref):
    # x_ref: [TM, K] (compute dtype), w_ref: [K, N] (compute dtype),
    # b_ref: [1, N] (f32), o_ref: [TM, N] (output dtype).
    acc = jnp.dot(x_ref[...], w_ref[...], preferred_element_type=jnp.float32)
    o_ref[...] = (acc + b_ref[...]).astype(o_ref.dtype)


def _round_up(x, m):
    return (x + m - 1) // m * m


def prepare_projector_params(weight, bias, *, compute_dtype=jnp.bfloat16):
    """Call-once parameter prep (hoisted out of the per-call path).

    weight: [out_features, in_features] (PyTorch nn.Linear layout)
            -> [in_features, out_features] in `compute_dtype` (MXU-friendly).
    bias:   [out_features] -> [1, out_features] in float32.
    """
    w_t = jnp.asarray(weight).T.astype(compute_dtype)            # [K, N]
    b2d = jnp.asarray(bias, dtype=jnp.float32).reshape(1, -1)    # [1, N]
    return w_t, b2d


def projector_forward_prepared(x, w_t, b2d, *, tm=256,
                               compute_dtype=jnp.bfloat16,
                               vmem_limit_bytes=48 * 1024 * 1024):
    """y = x @ w_t + b with pre-transposed weight w_t: [K, N]."""
    B, S, K = x.shape
    K2, N = w_t.shape
    assert K == K2, "in_features mismatch"
    M = B * S

    x2d = x.reshape(M, K).astype(compute_dtype)

    # Ragged-tail handling: pad rows up to a multiple of the row tile.
    Mp = _round_up(M, tm)
    if Mp != M:
        x2d = jnp.pad(x2d, ((0, Mp - M), (0, 0)))

    out2d = pl.pallas_call(
        _projector_kernel,
        out_shape=jax.ShapeDtypeStruct((Mp, N), x.dtype),
        grid_spec=pltpu.PrefetchScalarGridSpec(
            num_scalar_prefetch=0,
            grid=(Mp // tm,),
            in_specs=[
                pl.BlockSpec((tm, K), lambda i: (i, 0)),   # x row tile (pipelined)
                pl.BlockSpec((K, N), lambda i: (0, 0)),    # full weight (resident)
                pl.BlockSpec((1, N), lambda i: (0, 0)),    # bias (resident)
            ],
            out_specs=pl.BlockSpec((tm, N), lambda i: (i, 0)),
        ),
        compiler_params=pltpu.CompilerParams(
            dimension_semantics=("parallel",),
            vmem_limit_bytes=vmem_limit_bytes,
        ),
    )(x2d, w_t, b2d)

    if Mp != M:
        out2d = out2d[:M]
    return out2d.reshape(B, S, N)


def paligemma_multimodal_projector(x, weight, bias, *, tm=256,
                                   compute_dtype=jnp.bfloat16,
                                   vmem_limit_bytes=48 * 1024 * 1024):
    """Forward pass of PaliGemmaMultiModalProjector (nn.Linear semantics).

    Args:
      x:      [batch, seq, in_features]
      weight: [out_features, in_features]   (PyTorch nn.Linear convention)
      bias:   [out_features]
    Returns:
      [batch, seq, out_features] in x.dtype.
    """
    w_t, b2d = prepare_projector_params(weight, bias, compute_dtype=compute_dtype)
    return projector_forward_prepared(
        x, w_t, b2d, tm=tm, compute_dtype=compute_dtype,
        vmem_limit_bytes=vmem_limit_bytes)


if __name__ == "__main__":
    # Small shapes consistent with the module: vision tokens -> language hidden.
    batch, seq = 2, 8
    in_features, out_features = 32, 64

    key = jax.random.PRNGKey(0)
    kx, kw, kb = jax.random.split(key, 3)

    x = jax.random.normal(kx, (batch, seq, in_features), dtype=jnp.float32)
    # Deterministic synthetic parameters (shapes from nn.Linear(in, out)).
    weight = jax.random.normal(kw, (out_features, in_features), dtype=jnp.float32) * 0.02
    bias = jax.random.normal(kb, (out_features,), dtype=jnp.float32) * 0.02

    out = paligemma_multimodal_projector(x, weight, bias)
    out = jax.block_until_ready(out)

    # Pure-JAX f32 reference (same semantics as torch nn.Linear).  Tolerance is
    # loosened slightly because the kernel feeds the MXU bf16 inputs (f32 acc).
    ref = x @ weight.T + bias
    assert out.shape == (batch, seq, out_features)
    assert out.dtype == x.dtype
    assert jnp.allclose(out, ref, atol=2e-2, rtol=2e-2)

    print("KERNEL_OK")
</pallas_src>

<mosaic_0001>
module attributes {stable_mosaic.version = 11 : i64} {
  func.func @_projector_kernel(%arg0: i32, %arg1: memref<256x32xbf16, #tpu.memory_space<vmem>>, %arg2: memref<32x64xbf16, #tpu.memory_space<vmem>>, %arg3: memref<1x64xf32, #tpu.memory_space<vmem>>, %arg4: memref<256x64xf32, #tpu.memory_space<vmem>>) attributes {dimension_semantics = [#tpu.dimension_semantics<parallel>], iteration_bounds = array<i64: 1>, scalar_prefetch = 0 : i64, scratch_operands = 0 : i64, tpu.core_type = #tpu.core_type<tc>, window_params = [{transform_indices = @transform_0, window_bounds = array<i64: 256, 32>}, {pipeline_mode = #tpu.pipeline_mode<synchronous>, transform_indices = @transform_1, window_bounds = array<i64: 32, 64>}, {pipeline_mode = #tpu.pipeline_mode<synchronous>, transform_indices = @transform_2, window_bounds = array<i64: 1, 64>}, {transform_indices = @transform_3, window_bounds = array<i64: 256, 64>}]} {
    %c0 = arith.constant 0 : index
    %c0_0 = arith.constant 0 : index
    %0 = vector.load %arg1[%c0, %c0_0] : memref<256x32xbf16, #tpu.memory_space<vmem>>, vector<256x32xbf16>
    %c0_1 = arith.constant 0 : index
    %c0_2 = arith.constant 0 : index
    %1 = vector.load %arg2[%c0_1, %c0_2] : memref<32x64xbf16, #tpu.memory_space<vmem>>, vector<32x64xbf16>
    %cst = arith.constant dense<0.000000e+00> : vector<256x64xf32>
    %2 = tpu.matmul %0, %1, %cst {dimension_numbers = #tpu.dot_dimension_numbers<[1], [0], [0], [1], [0, 0, 1, 1], [], []>} : vector<256x32xbf16>, vector<32x64xbf16>, vector<256x64xf32> -> vector<256x64xf32>
    %c0_3 = arith.constant 0 : index
    %c0_4 = arith.constant 0 : index
    %3 = vector.load %arg3[%c0_3, %c0_4] : memref<1x64xf32, #tpu.memory_space<vmem>>, vector<1x64xf32>
    %4 = vector.broadcast %3 : vector<1x64xf32> to vector<256x64xf32>
    %5 = arith.addf %2, %4 : vector<256x64xf32>
    %c0_5 = arith.constant 0 : index
    %c0_6 = arith.constant 0 : index
    %6 = vector.load %arg4[%c0_5, %c0_6] : memref<256x64xf32, #tpu.memory_space<vmem>>, vector<256x64xf32>
    tpu.vector_store %arg4[%c0_5, %c0_6], %5 {strides = array<i32>} : memref<256x64xf32, #tpu.memory_space<vmem>>, vector<256x64xf32>,
    return
  }
  func.func @transform_0(%arg0: i32) -> (i32, i32) {
    %c0_i32 = arith.constant 0 : i32
    %c0_i32_0 = arith.constant 0 : i32
    return %arg0, %c0_i32 : i32, i32
  }
  func.func @transform_1(%arg0: i32) -> (i32, i32) {
    %c0_i32 = arith.constant 0 : i32
    %c0_i32_0 = arith.constant 0 : i32
    %c0_i32_1 = arith.constant 0 : i32
    return %c0_i32, %c0_i32_0 : i32, i32
  }
  func.func @transform_2(%arg0: i32) -> (i32, i32) {
    %c0_i32 = arith.constant 0 : i32
    %c0_i32_0 = arith.constant 0 : i32
    %c0_i32_1 = arith.constant 0 : i32
    return %c0_i32, %c0_i32_0 : i32, i32
  }
  func.func @transform_3(%arg0: i32) -> (i32, i32) {
    %c0_i32 = arith.constant 0 : i32
    %c0_i32_0 = arith.constant 0 : i32
    return %arg0, %c0_i32 : i32, i32
  }
}

</mosaic_0001>

<bundles_post_ra>
// kernel: tpu_custom_call.1
= control target key start
LH: loop header
LB: loop body
LE: loop exit
PB: predicated region body
PF: predicated region fallthrough
CT: control target
= control target key end

     0   :  { %vm150_vm0 = vcmask 261120   ;;  %vm360_vm1 = vcmask 523264   ;;  %s763_s1 = inlined_call_operand.vmem [shape: bf16[32,64], index: 1, kind: input, shape index: {}]   ;;  %s764_s0 = inlined_call_operand.vmem [shape: bf16[256,32], index: 0, kind: input, shape index: {}]   ;;  %s765_s2 = inlined_call_operand.vmem [shape: f32[1,64], index: 2, kind: input, shape index: {}]   ;;  %s766_s3 = inlined_call_operand.vmem [shape: f32[256,64], index: 3, kind: output, shape index: {}]  }
   0x1   :  { %v490_v0 = vld [vmem:[%s763_s1] sm:$0xff]   ;;  %v491_v1 = vld [vmem:[%s763_s1 + $0x8] sm:$0xff]   ;;  %v496_v6 = vld [vmem:[%s764_s0 + $0x10] sm:$0xff]  }
   0x2   :  { %450 = vmatprep.subr.bf16.mxu0 %v490_v0  ;;  %486 = vmatprep.subr.bf16.mxu1 %v490_v0  ;;  %v492_v2 = vld [vmem:[%s764_s0] sm:$0xff]   ;;  %v494_v4 = vld [vmem:[%s764_s0 + $0x8] sm:$0xff]   ;;  %v497_v7 = vld [vmem:[%s764_s0 + $0x50] sm:$0xff]  }
   0x3   :  { %451 = vmatpush3.bf16.msra.mxu0 %v490_v0  ;;  %488 = vmatpush3.bf16.msra.mxu1 %v490_v0  ;;  %v493_v3 = vld [vmem:[%s764_s0 + $0x40] sm:$0xff]   ;;  %v495_v5 = vld [vmem:[%s764_s0 + $0x48] sm:$0xff]   ;;  %v498_v8 = vld [vmem:[%s764_s0 + $0x18] sm:$0xff]  }
   0x4   :  { %452 = vmatprep.subr.bf16.mxu0 %v491_v1  ;;  %487 = vmatprep.subr.bf16.mxu1 %v491_v1  ;;  %v499_v9 = vld [vmem:[%s764_s0 + $0x58] sm:$0xff]   ;;  %v500_v10 = vld [vmem:[%s764_s0 + $0x20] sm:$0xff]   ;;  %v502_v12 = vld [vmem:[%s764_s0 + $0x28] sm:$0xff]  }
   0x5   :  { %454 = vmatprep.mubr.msk.bf16.mxu0 %vm150_vm0, %v492_v2  ;;  %470 = vmatprep.mubr.msk.bf16.mxu1 %vm150_vm0, %v493_v3  ;;  %v501_v11 = vld [vmem:[%s764_s0 + $0x60] sm:$0xff]   ;;  %v503_v13 = vld [vmem:[%s764_s0 + $0x68] sm:$0xff]   ;;  %v504_v14 = vld [vmem:[%s764_s0 + $0x30] sm:$0xff]  }
   0x6   :  { %v505_v15 = vld [vmem:[%s764_s0 + $0x70] sm:$0xff]   ;;  %v506_v16 = vld [vmem:[%s764_s0 + $0x38] sm:$0xff]   ;;  %v601_v18 = vld [vmem:[%s765_s2] ss:$0 sm:$0xff] }
   0x7   :  { %453 = vmatpush3.bf16.msra.mxu0 %v491_v1  ;;  %489 = vmatpush3.bf16.msra.mxu1 %v491_v1  ;;  %v507_v17 = vld [vmem:[%s764_s0 + $0x78] sm:$0xff]  }
   0xa   :  { %455 = vmatmul.mubr.msk.bf16.vlgmr.msra.gmra.mrb[0].mxu0 %vm150_vm0, %v494_v4  ;;  %471 = vmatmul.mubr.msk.bf16.vlgmr.msra.gmra.mrb[0].mxu1 %vm150_vm0, %v495_v5 }
   0xb   :  { %458 = vmatprep.mubr.msk.bf16.mxu0 %vm150_vm0, %v496_v6  ;;  %474 = vmatprep.mubr.msk.bf16.mxu1 %vm150_vm0, %v497_v7 }
  0x12   :  { %459 = vmatmul.mubr.msk.bf16.gmra.mrb[4].mxu0 %vm150_vm0, %v498_v8  ;;  %475 = vmatmul.mubr.msk.bf16.gmra.mrb[4].mxu1 %vm150_vm0, %v499_v9 }
  0x13   :  { %462 = vmatprep.mubr.msk.bf16.mxu0 %vm150_vm0, %v500_v10  ;;  %478 = vmatprep.mubr.msk.bf16.mxu1 %vm150_vm0, %v501_v11 }
  0x1a   :  { %463 = vmatmul.mubr.msk.bf16.gmra.mrb[8].mxu0 %vm150_vm0, %v502_v12  ;;  %479 = vmatmul.mubr.msk.bf16.gmra.mrb[8].mxu1 %vm150_vm0, %v503_v13 }
  0x1b   :  { %466 = vmatprep.mubr.msk.bf16.mxu0 %vm150_vm0, %v504_v14  ;;  %482 = vmatprep.mubr.msk.bf16.mxu1 %vm150_vm0, %v505_v15 }
  0x22   :  { %467 = vmatmul.mubr.msk.bf16.gmra.mrb[12].mxu0 %vm150_vm0, %v506_v16  ;;  %483 = vmatmul.mubr.msk.bf16.gmra.mrb[12].mxu1 %vm150_vm0, %v507_v17 }
  0xdd   :  { %v456_v19 = vpop.f32.mrb[0].mxu0  ;;  %v472_v20 = vpop.f32.mrb[0].mxu1 }
  0xde   :  { %v242_v21 = vadd.f32 %v456_v19, %v601_v18  ;;  %v306_v22 = vadd.f32 %v472_v20, %v601_v18  ;;  %v233_v23 = vpop.f32.mrb[1].mxu0  ;;  %v297_v24 = vpop.f32.mrb[1].mxu1 }
  0xdf   :  { %v234_v25 = vadd.f32 %v601_v18, %v233_v23  ;;  %v298_v26 = vadd.f32 %v601_v18, %v297_v24  ;;  %v457_v27 = vpop.f32.mrb[2].mxu0  ;;  %v473_v28 = vpop.f32.mrb[2].mxu1 }
  0xe0   :  { %363 = vst.msk [vmem:[%s766_s3 + $0x10] sm:$0xff] %vm360_vm1, %v242_v21  ;;  %379 = vst.msk [vmem:[%s766_s3 + $0x90] sm:$0xff] %vm360_vm1, %v306_v22  ;;  %v245_v29 = vadd.f32 %v457_v27, %v601_v18  ;;  %v309_v30 = vadd.f32 %v473_v28, %v601_v18  ;;  %v236_v31 = vpop.f32.mrb[3].mxu0  ;;  %v300_v32 = vpop.f32.mrb[3].mxu1 }
  0xe1   :  { %361 = vst.msk [vmem:[%s766_s3] sm:$0xff] %vm360_vm1, %v234_v25  ;;  %377 = vst.msk [vmem:[%s766_s3 + $0x80] sm:$0xff] %vm360_vm1, %v298_v26  ;;  %v237_v33 = vadd.f32 %v601_v18, %v236_v31  ;;  %v301_v34 = vadd.f32 %v601_v18, %v300_v32 }
  0xe2   :  { %364 = vst.msk [vmem:[%s766_s3 + $0x18] sm:$0xff] %vm360_vm1, %v245_v29  ;;  %380 = vst.msk [vmem:[%s766_s3 + $0x98] sm:$0xff] %vm360_vm1, %v309_v30 }
  0xe3   :  { %362 = vst.msk [vmem:[%s766_s3 + $0x8] sm:$0xff] %vm360_vm1, %v237_v33  ;;  %378 = vst.msk [vmem:[%s766_s3 + $0x88] sm:$0xff] %vm360_vm1, %v301_v34 }
  0xe5   :  { %v460_v35 = vpop.f32.mrb[4].mxu0  ;;  %v476_v36 = vpop.f32.mrb[4].mxu1 }
  0xe6   :  { %v258_v37 = vadd.f32 %v460_v35, %v601_v18  ;;  %v322_v38 = vadd.f32 %v476_v36, %v601_v18  ;;  %v249_v39 = vpop.f32.mrb[5].mxu0  ;;  %v313_v40 = vpop.f32.mrb[5].mxu1 }
  0xe7   :  { %v250_v41 = vadd.f32 %v601_v18, %v249_v39  ;;  %v314_v42 = vadd.f32 %v601_v18, %v313_v40  ;;  %v461_v43 = vpop.f32.mrb[6].mxu0  ;;  %v477_v44 = vpop.f32.mrb[6].mxu1 }
  0xe8   :  { %367 = vst.msk [vmem:[%s766_s3 + $0x30] sm:$0xff] %vm360_vm1, %v258_v37  ;;  %383 = vst.msk [vmem:[%s766_s3 + $0xb0] sm:$0xff] %vm360_vm1, %v322_v38  ;;  %v261_v45 = vadd.f32 %v461_v43, %v601_v18  ;;  %v325_v46 = vadd.f32 %v477_v44, %v601_v18  ;;  %v252_v47 = vpop.f32.mrb[7].mxu0  ;;  %v316_v48 = vpop.f32.mrb[7].mxu1 }
  0xe9   :  { %365 = vst.msk [vmem:[%s766_s3 + $0x20] sm:$0xff] %vm360_vm1, %v250_v41  ;;  %381 = vst.msk [vmem:[%s766_s3 + $0xa0] sm:$0xff] %vm360_vm1, %v314_v42  ;;  %v253_v49 = vadd.f32 %v601_v18, %v252_v47  ;;  %v317_v50 = vadd.f32 %v601_v18, %v316_v48 }
  0xea   :  { %368 = vst.msk [vmem:[%s766_s3 + $0x38] sm:$0xff] %vm360_vm1, %v261_v45  ;;  %384 = vst.msk [vmem:[%s766_s3 + $0xb8] sm:$0xff] %vm360_vm1, %v325_v46 }
  0xeb   :  { %366 = vst.msk [vmem:[%s766_s3 + $0x28] sm:$0xff] %vm360_vm1, %v253_v49  ;;  %382 = vst.msk [vmem:[%s766_s3 + $0xa8] sm:$0xff] %vm360_vm1, %v317_v50 }
  0xed   :  { %v464_v51 = vpop.f32.mrb[8].mxu0  ;;  %v480_v52 = vpop.f32.mrb[8].mxu1 }
  0xee   :  { %v274_v53 = vadd.f32 %v464_v51, %v601_v18  ;;  %v338_v54 = vadd.f32 %v480_v52, %v601_v18  ;;  %v265_v55 = vpop.f32.mrb[9].mxu0  ;;  %v329_v56 = vpop.f32.mrb[9].mxu1 }
  0xef   :  { %v266_v57 = vadd.f32 %v601_v18, %v265_v55  ;;  %v330_v58 = vadd.f32 %v601_v18, %v329_v56  ;;  %v465_v59 = vpop.f32.mrb[10].mxu0  ;;  %v481_v60 = vpop.f32.mrb[10].mxu1 }
  0xf0   :  { %371 = vst.msk [vmem:[%s766_s3 + $0x50] sm:$0xff] %vm360_vm1, %v274_v53  ;;  %387 = vst.msk [vmem:[%s766_s3 + $0xd0] sm:$0xff] %vm360_vm1, %v338_v54  ;;  %v277_v61 = vadd.f32 %v465_v59, %v601_v18  ;;  %v341_v62 = vadd.f32 %v481_v60, %v601_v18  ;;  %v268_v63 = vpop.f32.mrb[11].mxu0  ;;  %v332_v0 = vpop.f32.mrb[11].mxu1 }
  0xf1   :  { %369 = vst.msk [vmem:[%s766_s3 + $0x40] sm:$0xff] %vm360_vm1, %v266_v57  ;;  %385 = vst.msk [vmem:[%s766_s3 + $0xc0] sm:$0xff] %vm360_vm1, %v330_v58  ;;  %v269_v1 = vadd.f32 %v601_v18, %v268_v63  ;;  %v333_v2 = vadd.f32 %v601_v18, %v332_v0 }
  0xf2   :  { %372 = vst.msk [vmem:[%s766_s3 + $0x58] sm:$0xff] %vm360_vm1, %v277_v61  ;;  %388 = vst.msk [vmem:[%s766_s3 + $0xd8] sm:$0xff] %vm360_vm1, %v341_v62 }
  0xf3   :  { %370 = vst.msk [vmem:[%s766_s3 + $0x48] sm:$0xff] %vm360_vm1, %v269_v1  ;;  %386 = vst.msk [vmem:[%s766_s3 + $0xc8] sm:$0xff] %vm360_vm1, %v333_v2 }
  0xf5   :  { %v468_v3 = vpop.f32.mrb[12].mxu0  ;;  %v484_v4 = vpop.f32.mrb[12].mxu1 }
  0xf6   :  { %v290_v5 = vadd.f32 %v468_v3, %v601_v18  ;;  %v354_v6 = vadd.f32 %v484_v4, %v601_v18  ;;  %v281_v7 = vpop.f32.mrb[13].mxu0  ;;  %v345_v8 = vpop.f32.mrb[13].mxu1 }
  0xf7   :  { %v282_v9 = vadd.f32 %v601_v18, %v281_v7  ;;  %v346_v10 = vadd.f32 %v601_v18, %v345_v8  ;;  %v469_v11 = vpop.f32.mrb[14].mxu0  ;;  %v485_v12 = vpop.f32.mrb[14].mxu1 }
  0xf8   :  { %375 = vst.msk [vmem:[%s766_s3 + $0x70] sm:$0xff] %vm360_vm1, %v290_v5  ;;  %391 = vst.msk [vmem:[%s766_s3 + $0xf0] sm:$0xff] %vm360_vm1, %v354_v6  ;;  %v293_v13 = vadd.f32 %v469_v11, %v601_v18  ;;  %v357_v14 = vadd.f32 %v485_v12, %v601_v18  ;;  %v284_v15 = vpop.f32.mrb[15].mxu0  ;;  %v348_v16 = vpop.f32.mrb[15].mxu1 }
  0xf9   :  { %373 = vst.msk [vmem:[%s766_s3 + $0x60] sm:$0xff] %vm360_vm1, %v282_v9  ;;  %389 = vst.msk [vmem:[%s766_s3 + $0xe0] sm:$0xff] %vm360_vm1, %v346_v10  ;;  %v285_v17 = vadd.f32 %v601_v18, %v284_v15  ;;  %v349_v19 = vadd.f32 %v601_v18, %v348_v16 }
  0xfa   :  { %376 = vst.msk [vmem:[%s766_s3 + $0x78] sm:$0xff] %vm360_vm1, %v293_v13  ;;  %392 = vst.msk [vmem:[%s766_s3 + $0xf8] sm:$0xff] %vm360_vm1, %v357_v14 }
  0xfb   :  { %374 = vst.msk [vmem:[%s766_s3 + $0x68] sm:$0xff] %vm360_vm1, %v285_v17  ;;  %390 = vst.msk [vmem:[%s766_s3 + $0xe8] sm:$0xff] %vm360_vm1, %v349_v19 }

</bundles_post_ra>
